<compile_context>
chip_gen: v7x
topology: tpu7x:2x2x1
jax: 0.10.0
libtpu: 0.0.40
codegen_flags: <defaults>
</compile_context>

<pallas_src>
import functools

import jax
import jax.numpy as jnp
from jax.experimental import pallas as pl
from jax.experimental.pallas import tpu as pltpu


def _round_up(x, m):
    return ((x + m - 1) // m) * m


def _actor_kernel(state_ref,
                  w1_ref, b1_ref,
                  w2_ref, b2_ref,
                  wh_ref, bh_ref,
                  mean_ref, log_std_ref, *, a_pad):
    x = state_ref[...]                                            # (TB, S) f32

    # Trunk: Linear -> ReLU -> Linear -> ReLU   (MXU matmuls, VPU relu)
    h1 = jnp.dot(x, w1_ref[...], preferred_element_type=jnp.float32) + b1_ref[...]
    h1 = jnp.maximum(h1, 0.0)
    h2 = jnp.dot(h1, w2_ref[...], preferred_element_type=jnp.float32) + b2_ref[...]
    h2 = jnp.maximum(h2, 0.0)

    # Fused heads: one matmul produces [mean | log_std] columns, each half is a
    # 128-aligned tile, so the static slices below are free (no cross-lane moves).
    head = jnp.dot(h2, wh_ref[...], preferred_element_type=jnp.float32) + bh_ref[...]

    mean_ref[...] = jnp.tanh(head[:, :a_pad])                     # EUP, mean tile only
    log_std_ref[...] = jnp.clip(head[:, a_pad:], -20.0, 2.0)      # VPU, log_std tile only


def _vmem_limit_bytes(tb, s, h, a_pad):
    """VMEM budget with (8,128) tile lane/sublane padding accounted for."""
    f32 = 4

    def tile_bytes(rows, cols):
        return _round_up(rows, 8) * _round_up(cols, 128) * f32

    a2 = 2 * a_pad
    # Resident weights / biases (default pipelining double-buffers them).
    weights = 2 * (tile_bytes(s, h) + tile_bytes(1, h)
                   + tile_bytes(h, h) + tile_bytes(1, h)
                   + tile_bytes(h, a2) + tile_bytes(1, a2))
    # Streamed state tile + two output tiles, double-buffered.
    io = 2 * (tile_bytes(tb, s) + 2 * tile_bytes(tb, a_pad))
    # Intermediates: h1, h2 and the fused head activation.
    interm = 2 * tile_bytes(tb, h) + tile_bytes(tb, a2)
    need = weights + io + interm

    try:
        cap = int(0.75 * pltpu.get_tpu_info().vmem_capacity_bytes)
    except Exception:
        cap = 48 << 20   # conservative fallback (fits v7x's 64 MiB physical VMEM)
    return int(min(max(2 * need, 16 << 20), cap))


def actor_forward(state, params, *, tb=2048):
    """state: (B, state_dim) f32; params from init_params (lane-padded)."""
    B, S = state.shape
    H = params["w1"].shape[1]          # padded hidden (multiple of 128)
    A2 = params["wh"].shape[1]         # 2 * padded action dim
    a_pad = A2 // 2
    action_dim = params["action_dim"]

    # Batch tile: multiple of 8 sublanes, capped near the batch; no row padding
    # of the inputs — the ragged last block is handled by Pallas.
    TB = min(_round_up(tb, 8), _round_up(B, 8))
    grid = (pl.cdiv(B, TB),)
    resident = lambda i: (0, 0)        # weights/biases stay in VMEM across steps

    mean_p, log_std_p = pl.pallas_call(
        functools.partial(_actor_kernel, a_pad=a_pad),
        out_shape=(jax.ShapeDtypeStruct((B, a_pad), jnp.float32),
                   jax.ShapeDtypeStruct((B, a_pad), jnp.float32)),
        grid=grid,
        in_specs=[
            pl.BlockSpec((TB, S), lambda i: (i, 0)),   # state tile (streamed)
            pl.BlockSpec((S, H), resident),            # w1
            pl.BlockSpec((1, H), resident),            # b1
            pl.BlockSpec((H, H), resident),            # w2
            pl.BlockSpec((1, H), resident),            # b2
            pl.BlockSpec((H, A2), resident),           # fused head weight
            pl.BlockSpec((1, A2), resident),           # fused head bias
        ],
        out_specs=(pl.BlockSpec((TB, a_pad), lambda i: (i, 0)),   # mean (lane-dense)
                   pl.BlockSpec((TB, a_pad), lambda i: (i, 0))),  # log_std (lane-dense)
        compiler_params=pltpu.CompilerParams(
            dimension_semantics=("parallel",),
            vmem_limit_bytes=_vmem_limit_bytes(TB, S, H, a_pad),
        ),
    )(state,
      params["w1"], params["b1"],
      params["w2"], params["b2"],
      params["wh"], params["bh"])

    return mean_p[:, :action_dim], log_std_p[:, :action_dim]


def init_params(key, state_dim, action_dim, hidden_dim):
    """Torch-Linear-like uniform init, with hidden and head widths zero-padded
    to multiples of 128 lanes and the two head Linears fused into one
    (H_pad, 2*A_pad) weight / (1, 2*A_pad) bias.  Zero padding is exact
    (ReLU(0)=0, zero rows/cols contribute nothing)."""
    h_pad = _round_up(hidden_dim, 128)
    a_pad = _round_up(action_dim, 128)

    def linear(k, fan_in, fan_out, in_pad, out_pad):
        kw, kb = jax.random.split(k)
        bound = 1.0 / (fan_in ** 0.5)
        w = jax.random.uniform(kw, (fan_in, fan_out), jnp.float32, -bound, bound)
        b = jax.random.uniform(kb, (1, fan_out), jnp.float32, -bound, bound)
        w = jnp.pad(w, ((0, in_pad - fan_in), (0, out_pad - fan_out)))
        b = jnp.pad(b, ((0, 0), (0, out_pad - fan_out)))
        return w, b

    k1, k2, k3, k4 = jax.random.split(key, 4)
    w1, b1 = linear(k1, state_dim, hidden_dim, state_dim, h_pad)
    w2, b2 = linear(k2, hidden_dim, hidden_dim, h_pad, h_pad)
    wm, bm = linear(k3, hidden_dim, action_dim, h_pad, a_pad)   # mean head
    ws, bs = linear(k4, hidden_dim, action_dim, h_pad, a_pad)   # log_std head
    wh = jnp.concatenate([wm, ws], axis=1)                      # (H_pad, 2*A_pad)
    bh = jnp.concatenate([bm, bs], axis=1)                      # (1, 2*A_pad)
    return dict(w1=w1, b1=b1, w2=w2, b2=b2, wh=wh, bh=bh, action_dim=action_dim)


def reference_forward(state, p):
    """Pure-JAX reference of the PyTorch Actor.forward (uses the same padded
    params; zero padding is mathematically inert)."""
    a = p["action_dim"]
    a_pad = p["wh"].shape[1] // 2
    h = jnp.maximum(state @ p["w1"] + p["b1"], 0.0)
    h = jnp.maximum(h @ p["w2"] + p["b2"], 0.0)
    head = h @ p["wh"] + p["bh"]
    mean = jnp.tanh(head[:, :a])
    log_std = jnp.clip(head[:, a_pad:a_pad + a], -20.0, 2.0)
    return mean, log_std


if __name__ == "__main__":
    # Small shapes consistent with the module: batch=8, state_dim=8,
    # action_dim=4, hidden_dim=32.
    batch, state_dim, action_dim, hidden_dim = 8, 8, 4, 32

    key = jax.random.PRNGKey(0)
    k_params, k_state = jax.random.split(key)
    params = init_params(k_params, state_dim, action_dim, hidden_dim)
    state = jax.random.normal(k_state, (batch, state_dim), jnp.float32)

    mean, log_std = actor_forward(state, params)
    jax.block_until_ready((mean, log_std))

    ref_mean, ref_log_std = reference_forward(state, params)
    assert mean.shape == (batch, action_dim)
    assert log_std.shape == (batch, action_dim)
    assert jnp.allclose(mean, ref_mean, atol=1e-5, rtol=1e-5)
    assert jnp.allclose(log_std, ref_log_std, atol=1e-5, rtol=1e-5)

    # Also check a batch that is not a multiple of the tile / of 8 to exercise
    # the ragged-last-block (no wrapper padding) path with >1 grid step.
    big_state = jax.random.normal(jax.random.PRNGKey(1), (1000, state_dim), jnp.float32)
    bm2, bl2 = actor_forward(big_state, params, tb=512)
    jax.block_until_ready((bm2, bl2))
    rm2, rl2 = reference_forward(big_state, params)
    assert bm2.shape == (1000, action_dim) and bl2.shape == (1000, action_dim)
    assert jnp.allclose(bm2, rm2, atol=1e-5, rtol=1e-5)
    assert jnp.allclose(bl2, rl2, atol=1e-5, rtol=1e-5)

    print("KERNEL_OK")
</pallas_src>

<mosaic_0001>
module attributes {stable_mosaic.version = 11 : i64} {
  func.func @_actor_kernel(%arg0: i32, %arg1: memref<8x8xf32, #tpu.memory_space<vmem>>, %arg2: memref<8x128xf32, #tpu.memory_space<vmem>>, %arg3: memref<1x128xf32, #tpu.memory_space<vmem>>, %arg4: memref<128x128xf32, #tpu.memory_space<vmem>>, %arg5: memref<1x128xf32, #tpu.memory_space<vmem>>, %arg6: memref<128x256xf32, #tpu.memory_space<vmem>>, %arg7: memref<1x256xf32, #tpu.memory_space<vmem>>, %arg8: memref<8x128xf32, #tpu.memory_space<vmem>>, %arg9: memref<8x128xf32, #tpu.memory_space<vmem>>) attributes {dimension_semantics = [#tpu.dimension_semantics<parallel>], iteration_bounds = array<i64: 1>, scalar_prefetch = 0 : i64, scratch_operands = 0 : i64, tpu.core_type = #tpu.core_type<tc>, window_params = [{transform_indices = @transform_0, window_bounds = array<i64: 8, 8>}, {pipeline_mode = #tpu.pipeline_mode<synchronous>, transform_indices = @transform_1, window_bounds = array<i64: 8, 128>}, {pipeline_mode = #tpu.pipeline_mode<synchronous>, transform_indices = @transform_2, window_bounds = array<i64: 1, 128>}, {pipeline_mode = #tpu.pipeline_mode<synchronous>, transform_indices = @transform_3, window_bounds = array<i64: 128, 128>}, {pipeline_mode = #tpu.pipeline_mode<synchronous>, transform_indices = @transform_4, window_bounds = array<i64: 1, 128>}, {pipeline_mode = #tpu.pipeline_mode<synchronous>, transform_indices = @transform_5, window_bounds = array<i64: 128, 256>}, {pipeline_mode = #tpu.pipeline_mode<synchronous>, transform_indices = @transform_6, window_bounds = array<i64: 1, 256>}, {transform_indices = @transform_7, window_bounds = array<i64: 8, 128>}, {transform_indices = @transform_8, window_bounds = array<i64: 8, 128>}]} {
    %c0 = arith.constant 0 : index
    %c0_0 = arith.constant 0 : index
    %0 = vector.load %arg1[%c0, %c0_0] : memref<8x8xf32, #tpu.memory_space<vmem>>, vector<8x8xf32>
    %c0_1 = arith.constant 0 : index
    %c0_2 = arith.constant 0 : index
    %1 = vector.load %arg2[%c0_1, %c0_2] : memref<8x128xf32, #tpu.memory_space<vmem>>, vector<8x128xf32>
    %cst = arith.constant dense<0.000000e+00> : vector<8x128xf32>
    %2 = tpu.matmul %0, %1, %cst {dimension_numbers = #tpu.dot_dimension_numbers<[1], [0], [0], [1], [0, 0, 1, 1], [], []>} : vector<8x8xf32>, vector<8x128xf32>, vector<8x128xf32> -> vector<8x128xf32>
    %c0_3 = arith.constant 0 : index
    %c0_4 = arith.constant 0 : index
    %3 = vector.load %arg3[%c0_3, %c0_4] : memref<1x128xf32, #tpu.memory_space<vmem>>, vector<1x128xf32>
    %4 = vector.broadcast %3 : vector<1x128xf32> to vector<8x128xf32>
    %5 = arith.addf %2, %4 : vector<8x128xf32>
    %cst_5 = arith.constant 0.000000e+00 : f32
    %6 = vector.broadcast %cst_5 : f32 to vector<8x128xf32>
    %7 = arith.maximumf %5, %6 : vector<8x128xf32>
    %c0_6 = arith.constant 0 : index
    %c0_7 = arith.constant 0 : index
    %8 = vector.load %arg4[%c0_6, %c0_7] : memref<128x128xf32, #tpu.memory_space<vmem>>, vector<128x128xf32>
    %cst_8 = arith.constant dense<0.000000e+00> : vector<8x128xf32>
    %9 = tpu.matmul %7, %8, %cst_8 {dimension_numbers = #tpu.dot_dimension_numbers<[1], [0], [0], [1], [0, 0, 1, 1], [], []>} : vector<8x128xf32>, vector<128x128xf32>, vector<8x128xf32> -> vector<8x128xf32>
    %c0_9 = arith.constant 0 : index
    %c0_10 = arith.constant 0 : index
    %10 = vector.load %arg5[%c0_9, %c0_10] : memref<1x128xf32, #tpu.memory_space<vmem>>, vector<1x128xf32>
    %11 = vector.broadcast %10 : vector<1x128xf32> to vector<8x128xf32>
    %12 = arith.addf %9, %11 : vector<8x128xf32>
    %cst_11 = arith.constant 0.000000e+00 : f32
    %13 = vector.broadcast %cst_11 : f32 to vector<8x128xf32>
    %14 = arith.maximumf %12, %13 : vector<8x128xf32>
    %c0_12 = arith.constant 0 : index
    %c0_13 = arith.constant 0 : index
    %15 = vector.load %arg6[%c0_12, %c0_13] : memref<128x256xf32, #tpu.memory_space<vmem>>, vector<128x256xf32>
    %cst_14 = arith.constant dense<0.000000e+00> : vector<8x256xf32>
    %16 = tpu.matmul %14, %15, %cst_14 {dimension_numbers = #tpu.dot_dimension_numbers<[1], [0], [0], [1], [0, 0, 1, 1], [], []>} : vector<8x128xf32>, vector<128x256xf32>, vector<8x256xf32> -> vector<8x256xf32>
    %c0_15 = arith.constant 0 : index
    %c0_16 = arith.constant 0 : index
    %17 = vector.load %arg7[%c0_15, %c0_16] : memref<1x256xf32, #tpu.memory_space<vmem>>, vector<1x256xf32>
    %18 = vector.broadcast %17 : vector<1x256xf32> to vector<8x256xf32>
    %19 = arith.addf %16, %18 : vector<8x256xf32>
    %20 = vector.extract_strided_slice %19 {offsets = [0, 0], sizes = [8, 128], strides = [1, 1]} : vector<8x256xf32> to vector<8x128xf32>
    %21 = math.tanh %20 : vector<8x128xf32>
    %c0_17 = arith.constant 0 : index
    %c0_18 = arith.constant 0 : index
    %22 = vector.load %arg8[%c0_17, %c0_18] : memref<8x128xf32, #tpu.memory_space<vmem>>, vector<8x128xf32>
    tpu.vector_store %arg8[%c0_17, %c0_18], %21 {strides = array<i32>} : memref<8x128xf32, #tpu.memory_space<vmem>>, vector<8x128xf32>,
    %23 = vector.extract_strided_slice %19 {offsets = [0, 128], sizes = [8, 128], strides = [1, 1]} : vector<8x256xf32> to vector<8x128xf32>
    %cst_19 = arith.constant -2.000000e+01 : f32
    %cst_20 = arith.constant 2.000000e+00 : f32
    %24 = vector.broadcast %cst_19 : f32 to vector<8x128xf32>
    %25 = arith.maximumf %24, %23 : vector<8x128xf32>
    %26 = vector.broadcast %cst_20 : f32 to vector<8x128xf32>
    %27 = arith.minimumf %26, %25 : vector<8x128xf32>
    %c0_21 = arith.constant 0 : index
    %c0_22 = arith.constant 0 : index
    %28 = vector.load %arg9[%c0_21, %c0_22] : memref<8x128xf32, #tpu.memory_space<vmem>>, vector<8x128xf32>
    tpu.vector_store %arg9[%c0_21, %c0_22], %27 {strides = array<i32>} : memref<8x128xf32, #tpu.memory_space<vmem>>, vector<8x128xf32>,
    return
  }
  func.func @transform_0(%arg0: i32) -> (i32, i32) {
    %c0_i32 = arith.constant 0 : i32
    %c0_i32_0 = arith.constant 0 : i32
    return %arg0, %c0_i32 : i32, i32
  }
  func.func @transform_1(%arg0: i32) -> (i32, i32) {
    %c0_i32 = arith.constant 0 : i32
    %c0_i32_0 = arith.constant 0 : i32
    %c0_i32_1 = arith.constant 0 : i32
    return %c0_i32, %c0_i32_0 : i32, i32
  }
  func.func @transform_2(%arg0: i32) -> (i32, i32) {
    %c0_i32 = arith.constant 0 : i32
    %c0_i32_0 = arith.constant 0 : i32
    %c0_i32_1 = arith.constant 0 : i32
    return %c0_i32, %c0_i32_0 : i32, i32
  }
  func.func @transform_3(%arg0: i32) -> (i32, i32) {
    %c0_i32 = arith.constant 0 : i32
    %c0_i32_0 = arith.constant 0 : i32
    %c0_i32_1 = arith.constant 0 : i32
    return %c0_i32, %c0_i32_0 : i32, i32
  }
  func.func @transform_4(%arg0: i32) -> (i32, i32) {
    %c0_i32 = arith.constant 0 : i32
    %c0_i32_0 = arith.constant 0 : i32
    %c0_i32_1 = arith.constant 0 : i32
    return %c0_i32, %c0_i32_0 : i32, i32
  }
  func.func @transform_5(%arg0: i32) -> (i32, i32) {
    %c0_i32 = arith.constant 0 : i32
    %c0_i32_0 = arith.constant 0 : i32
    %c0_i32_1 = arith.constant 0 : i32
    return %c0_i32, %c0_i32_0 : i32, i32
  }
  func.func @transform_6(%arg0: i32) -> (i32, i32) {
    %c0_i32 = arith.constant 0 : i32
    %c0_i32_0 = arith.constant 0 : i32
    %c0_i32_1 = arith.constant 0 : i32
    return %c0_i32, %c0_i32_0 : i32, i32
  }
  func.func @transform_7(%arg0: i32) -> (i32, i32) {
    %c0_i32 = arith.constant 0 : i32
    %c0_i32_0 = arith.constant 0 : i32
    return %arg0, %c0_i32 : i32, i32
  }
  func.func @transform_8(%arg0: i32) -> (i32, i32) {
    %c0_i32 = arith.constant 0 : i32
    %c0_i32_0 = arith.constant 0 : i32
    return %arg0, %c0_i32 : i32, i32
  }
}

</mosaic_0001>

<bundles_post_ra>
// kernel: tpu_custom_call.1
= control target key start
LH: loop header
LB: loop body
LE: loop exit
PB: predicated region body
PF: predicated region fallthrough
CT: control target
= control target key end

     0   :  { %14 = vsyncpa [#allocation3], 0  ;;  %s824_s0 = inlined_call_operand.hbm [shape: f32[8,8], index: 0, kind: input, shape index: {}]   ;;  %s825_s1 = inlined_call_operand.hbm [shape: f32[8,128], index: 1, kind: input, shape index: {}]   ;;  %s826_s2 = inlined_call_operand.vmem [shape: f32[1,128], index: 2, kind: input, shape index: {}]   ;;  %s827_s3 = inlined_call_operand.hbm [shape: f32[128,128], index: 3, kind: input, shape index: {}]   ;;  %s828_s4 = inlined_call_operand.vmem [shape: f32[1,128], index: 4, kind: input, shape index: {}]   ;;  %s829_s5 = inlined_call_operand.hbm [shape: f32[128,256], index: 5, kind: input, shape index: {}]   ;;  %s830_s6 = inlined_call_operand.vmem [shape: f32[1,256], index: 6, kind: input, shape index: {}]   ;;  %s831_s7 = inlined_call_operand.hbm [shape: f32[8,128], index: 7, kind: output, shape index: {0}]   ;;  %s832_s8 = inlined_call_operand.hbm [shape: f32[8,128], index: 8, kind: output, shape index: {1}]  }
   0x1   :  { %15 = vsyncpa [#allocation6], 0 }
   0x2   :  { %16 = vsyncpa [#allocation9], 0 }
   0x3   :  { %17 = vsyncpa [#allocation4], 0 }
   0x4   :  { %18 = vsyncpa [#allocation12], 0  ;;  %s685_s27 = smov [#allocation5]   ;;  %s686_s29 = smov [#allocation2]  }
   0x5   :  { %s35_s28 = sshll.u32 %s685_s27, 4  ;;  %s25_s30 = sshll.u32 %s686_s29, 4  ;;  %s36_s28 = int_to_ptr.vmem [resolvable:$true] %s35_s28  ;;  %s26_s30 = int_to_ptr.vmem [resolvable:$true] %s25_s30 }
   0x6   :  { %s543_s11 = scalar_lea.hbm %s825_s1, 128 }
   0x7   :  { %p544_p0 = scmp.ne.s32.totalorder %s825_s1, %s543_s11  ;;  %p547_p1 = scmp.lt.u32.totalorder %s543_s11, %s825_s1 }
   0x9   :  { %p549_p2 = pnand %p547_p1, %p544_p0 }
   0xb   :  { %552 = shalt.err (!%p549_p2)
}
   0xc   :  { %s553_s16 = scalar_lea.vmem %s36_s28, 128  ;;  %p558_p4 = scmp.lt.s32.totalorder %s36_s28, %s36_s28 }
   0xd   :  { %p554_p3 = scmp.ne.s32.totalorder %s36_s28, %s553_s16  ;;  %p559_p5 = scmp.lt.s32.totalorder %s553_s16, %s553_s16 }
   0xf   :  { %p560_p6 = por %p559_p5, %p558_p4 }
  0x11   :  { %p561_p7 = pnand %p560_p6, %p554_p3 }
  0x13   :  { %564 = shalt.err (!%p561_p7)
}
  0x14   :  { %38 = dma.hbm_to_vmem [thread:$0]  %s825_s1, 128, %s36_s28, [#allocation6]  }
  0x15   :  { %s565_s21 = scalar_lea.hbm %s824_s0, 128 }
  0x16   :  { %p566_p8 = scmp.ne.s32.totalorder %s824_s0, %s565_s21  ;;  %p569_p9 = scmp.lt.u32.totalorder %s565_s21, %s824_s0 }
  0x18   :  { %p571_p10 = pnand %p569_p9, %p566_p8 }
  0x1a   :  { %574 = shalt.err (!%p571_p10)
}
  0x1b   :  { %s575_s26 = scalar_lea.vmem %s26_s30, 128  ;;  %p580_p12 = scmp.lt.s32.totalorder %s26_s30, %s26_s30 }
  0x1c   :  { %p576_p11 = scmp.ne.s32.totalorder %s26_s30, %s575_s26  ;;  %p581_p13 = scmp.lt.s32.totalorder %s575_s26, %s575_s26 }
  0x1e   :  { %p582_p0 = por %p581_p13, %p580_p12 }
  0x20   :  { %p583_p1 = pnand %p582_p0, %p576_p11 }
  0x22   :  { %586 = shalt.err (!%p583_p1)
}
  0x23   :  { %28 = dma.hbm_to_vmem [thread:$0]  %s824_s0, 128, %s26_s30, [#allocation3]  }
  0x24   :  { %s687_s28 = smov [#allocation7]   ;;  %s587_s11 = scalar_lea.hbm %s827_s3, 2048 }
  0x25   :  { %s46_s29 = sshll.u32 %s687_s28, 4  ;;  %p588_p2 = scmp.ne.s32.totalorder %s827_s3, %s587_s11  ;;  %s47_s29 = int_to_ptr.vmem [resolvable:$true] %s46_s29 }
  0x26   :  { %p591_p3 = scmp.lt.u32.totalorder %s587_s11, %s827_s3 }
  0x28   :  { %p593_p4 = pnand %p591_p3, %p588_p2 }
  0x2a   :  { %596 = shalt.err (!%p593_p4)
}
  0x2b   :  { %s597_s16 = scalar_lea.vmem %s47_s29, 2048  ;;  %p602_p6 = scmp.lt.s32.totalorder %s47_s29, %s47_s29 }
  0x2c   :  { %p598_p5 = scmp.ne.s32.totalorder %s47_s29, %s597_s16  ;;  %p603_p7 = scmp.lt.s32.totalorder %s597_s16, %s597_s16 }
  0x2e   :  { %p604_p8 = por %p603_p7, %p602_p6 }
  0x30   :  { %p605_p9 = pnand %p604_p8, %p598_p5 }
  0x32   :  { %608 = shalt.err (!%p605_p9)
}
  0x33   :  { %s688_s0 = smov 128   ;;  %s689_s30 = smov 8  }
  0x34   :  { %52 = dma.hbm_to_vmem [thread:$0]  %s827_s3, 2048, %s47_s29, [#allocation6], %s688_s0, %s688_s0, %s689_s30  }
  0x35   :  { %s690_s19 = smov [#allocation8]   ;;  %s609_s23 = scalar_lea.hbm %s829_s5, 4096 }
  0x36   :  { %s60_s20 = sshll.u32 %s690_s19, 4  ;;  %p610_p10 = scmp.ne.s32.totalorder %s829_s5, %s609_s23  ;;  %s61_s20 = int_to_ptr.vmem [resolvable:$true] %s60_s20 }
  0x37   :  { %p613_p11 = scmp.lt.u32.totalorder %s609_s23, %s829_s5 }
  0x39   :  { %p615_p12 = pnand %p613_p11, %p610_p10 }
  0x3b   :  { %618 = shalt.err (!%p615_p12)
}
  0x3c   :  { %s619_s27 = scalar_lea.vmem %s61_s20, 4096  ;;  %p624_p0 = scmp.lt.s32.totalorder %s61_s20, %s61_s20 }
  0x3d   :  { %p620_p13 = scmp.ne.s32.totalorder %s61_s20, %s619_s27  ;;  %p625_p1 = scmp.lt.s32.totalorder %s619_s27, %s619_s27 }
  0x3f   :  { %p626_p2 = por %p625_p1, %p624_p0 }
  0x41   :  { %p627_p3 = pnand %p626_p2, %p620_p13 }
  0x43   :  { %630 = shalt.err (!%p627_p3)
}
  0x44   :  { %s691_s3 = smov 256   ;;  %s692_s28 = smov 16  }
  0x45   :  { %66 = dma.hbm_to_vmem [thread:$0]  %s829_s5, 4096, %s61_s20, [#allocation9], %s691_s3, %s691_s3, %s692_s28  }
  0x46   :  { %675 = dma.done.wait [#allocation3], 128  }
  0x47   :  { %676 = vsyncadd [#allocation3], 4294967168 }
  0x48   :  { %677 = dma.done.wait [#allocation6], 2176  }
  0x49   :  { %678 = vsyncadd [#allocation6], 4294965120 }
  0x4a   :  { %679 = dma.done.wait [#allocation9], 4096  }
  0x4b   :  { %680 = vsyncadd [#allocation9], 4294963200  ;;  %v693_v0 = vmov 0.0   ;;  %vm694_vm0 = vmmov 0   ;;  %v695_v1 = vmov 0.0|0.0   ;;  %vm90_vm1 = vcmask 64512  }
  0x4c   :  { %432 = vmatprep.subr.mxu0 %v693_v0  ;;  %434 = vmatprep.mubr.msk.f32.mxu0 %vm694_vm0, %v693_v0  ;;  %v82_v2 = vld [vmem:[#allocation5] sm:$0xff]  ;;  %v81_v3 = vld [vmem:[#allocation2] sm:$0xff]  ;;  %v165_v4 = vld [vmem:[#allocation7] sm:$0xff]  ;;  %s697_s15 = smov [#allocation10]  }
  0x4d   :  { %472 = vmatprep.subr.bf16.mxu1 %v695_v1  ;;  %469 = vmatprep.mubr.msk.f32.mxu1 %vm694_vm0, %v693_v0  ;;  %v166_v5 = vld [vmem:[#allocation7 + $0x8] sm:$0xff]  ;;  %v167_v6 = vld [vmem:[#allocation7 + $0x10] sm:$0xff]  ;;  %v168_v7 = vld [vmem:[#allocation7 + $0x18] sm:$0xff]  ;;  %s385_s16 = sshll.u32 %s697_s15, 4  ;;  %s386_s16 = int_to_ptr.vmem [resolvable:$true] %s385_s16 }
  0x4e   :  { %433 = vmatpush3.msra.mxu0 %v82_v2  ;;  %v473_v8 = vpack.c.bf16 %v166_v5, %v165_v4  ;;  %v476_v9 = vpack.c.bf16 %v168_v7, %v167_v6  ;;  %v169_v10 = vld [vmem:[#allocation7 + $0x20] sm:$0xff]  ;;  %v170_v11 = vld [vmem:[#allocation7 + $0x28] sm:$0xff]  ;;  %v171_v13 = vld [vmem:[#allocation7 + $0x30] sm:$0xff] }
  0x4f   :  { %435 = vmatmul.mubr.msk.f32.vlgmr.msra.gmra.mrb[0].mxu0 %vm90_vm1, %v81_v3  ;;  %v479_v12 = vpack.c.bf16 %v170_v11, %v169_v10  ;;  %v172_v14 = vld [vmem:[#allocation7 + $0x38] sm:$0xff]  ;;  %v173_v16 = vld [vmem:[#allocation7 + $0x40] sm:$0xff]  ;;  %v174_v17 = vld [vmem:[#allocation7 + $0x48] sm:$0xff] }
  0x50   :  { %367 = vmatprep.mubr.f32.mxu0 %v693_v0  ;;  %474 = vmatpush3.bf16.msra.mxu1 %v473_v8  ;;  %v482_v15 = vpack.c.bf16 %v172_v14, %v171_v13  ;;  %v485_v18 = vpack.c.bf16 %v174_v17, %v173_v16  ;;  %v175_v19 = vld [vmem:[#allocation7 + $0x50] sm:$0xff]  ;;  %v176_v20 = vld [vmem:[#allocation7 + $0x58] sm:$0xff]  ;;  %v177_v22 = vld [vmem:[#allocation7 + $0x60] sm:$0xff] }
  0x51   :  { %475 = vmatprep.subr.bf16.mxu1 %v695_v1  ;;  %v488_v21 = vpack.c.bf16 %v176_v20, %v175_v19  ;;  %v178_v23 = vld [vmem:[#allocation7 + $0x68] sm:$0xff]  ;;  %v179_v25 = vld [vmem:[#allocation7 + $0x70] sm:$0xff]  ;;  %v180_v26 = vld [vmem:[#allocation7 + $0x78] sm:$0xff] }
  0x52   :  { %v491_v24 = vpack.c.bf16 %v178_v23, %v177_v22  ;;  %v494_v27 = vpack.c.bf16 %v180_v26, %v179_v25  ;;  %v260_v28 = vld [vmem:[#allocation8 + $0x8] sm:$0xff]  ;;  %v262_v29 = vld [vmem:[#allocation8 + $0x18] sm:$0xff]  ;;  %v259_v30 = vld [vmem:[#allocation8] sm:$0xff]  ;;  %v293_v22 = vlaneseq }
  0x53   :  { %v496_v31 = vpack.c.bf16 %v262_v29, %v260_v28  ;;  %v261_v32 = vld [vmem:[#allocation8 + $0x10] sm:$0xff]  ;;  %v264_v33 = vld [vmem:[#allocation8 + $0x28] sm:$0xff]  ;;  %v266_v34 = vld [vmem:[#allocation8 + $0x38] sm:$0xff] }
  0x54   :  { %477 = vmatpush3.bf16.msra.mxu1 %v476_v9  ;;  %v498_v35 = vpack.c.bf16 %v261_v32, %v259_v30  ;;  %v500_v36 = vpack.c.bf16 %v266_v34, %v264_v33  ;;  %v263_v37 = vld [vmem:[#allocation8 + $0x20] sm:$0xff]  ;;  %v265_v38 = vld [vmem:[#allocation8 + $0x30] sm:$0xff]  ;;  %v268_v39 = vld [vmem:[#allocation8 + $0x48] sm:$0xff]  ;;  %v294_v23 = vshrl.u32 %v293_v22, 7 }
  0x55   :  { %478 = vmatprep.subr.bf16.mxu1 %v695_v1  ;;  %497 = vmatprep.subr.bf16.mxu0 %v496_v31  ;;  %v270_v40 = vld [vmem:[#allocation8 + $0x58] sm:$0xff]  ;;  %v502_v41 = vpack.c.bf16 %v265_v38, %v263_v37  ;;  %v267_v43 = vld [vmem:[#allocation8 + $0x40] sm:$0xff]  ;;  %v269_v44 = vld [vmem:[#allocation8 + $0x50] sm:$0xff] }
  0x56   :  { %499 = vmatpush1.bf16.msra.mxu0 %v498_v35  ;;  %v504_v42 = vpack.c.bf16 %v270_v40, %v268_v39  ;;  %v272_v45 = vld [vmem:[#allocation8 + $0x68] sm:$0xff]  ;;  %v274_v46 = vld [vmem:[#allocation8 + $0x78] sm:$0xff]  ;;  %v506_v47 = vpack.c.bf16 %v269_v44, %v267_v43  ;;  %v271_v49 = vld [vmem:[#allocation8 + $0x60] sm:$0xff]  ;;  %v299_v26 = vsub.s32 1, %v294_v23 }
  0x57   :  { %501 = vmatprep.subr.bf16.mxu0 %v500_v36  ;;  %v508_v48 = vpack.c.bf16 %v274_v46, %v272_v45  ;;  %v273_v50 = vld [vmem:[#allocation8 + $0x70] sm:$0xff]  ;;  %v276_v51 = vld [vmem:[#allocation8 + $0x88] sm:$0xff]  ;;  %v278_v52 = vld [vmem:[#allocation8 + $0x98] sm:$0xff] }
  0x58   :  { %480 = vmatpush3.bf16.msra.mxu1 %v479_v12  ;;  %v510_v53 = vpack.c.bf16 %v273_v50, %v271_v49  ;;  %v512_v54 = vpack.c.bf16 %v278_v52, %v276_v51  ;;  %v275_v55 = vld [vmem:[#allocation8 + $0x80] sm:$0xff]  ;;  %v277_v56 = vld [vmem:[#allocation8 + $0x90] sm:$0xff]  ;;  %v280_v57 = vld [vmem:[#allocation8 + $0xa8] sm:$0xff] }
  0x59   :  { %481 = vmatprep.subr.bf16.mxu1 %v695_v1  ;;  %v282_v58 = vld [vmem:[#allocation8 + $0xb8] sm:$0xff]  ;;  %v514_v59 = vpack.c.bf16 %v277_v56, %v275_v55  ;;  %v279_v61 = vld [vmem:[#allocation8 + $0xa0] sm:$0xff]  ;;  %v281_v62 = vld [vmem:[#allocation8 + $0xb0] sm:$0xff] }
  0x5a   :  { %503 = vmatpush1.bf16.msra.mxu0 %v502_v41  ;;  %v516_v60 = vpack.c.bf16 %v282_v58, %v280_v57  ;;  %v284_v63 = vld [vmem:[#allocation8 + $0xc8] sm:$0xff]  ;;  %v286_v0 = vld [vmem:[#allocation8 + $0xd8] sm:$0xff]  ;;  %v283_v3 = vld [vmem:[#allocation8 + $0xc0] sm:$0xff] }
  0x5b   :  { %505 = vmatprep.subr.bf16.mxu0 %v504_v42  ;;  %v520_v2 = vpack.c.bf16 %v286_v0, %v284_v63  ;;  %v285_v4 = vld [vmem:[#allocation8 + $0xd0] sm:$0xff]  ;;  %v288_v11 = vld [vmem:[#allocation8 + $0xe8] sm:$0xff]  ;;  %v290_v12 = vld [vmem:[#allocation8 + $0xf8] sm:$0xff] }
  0x5c   :  { %483 = vmatpush3.bf16.msra.mxu1 %v482_v15  ;;  %v522_v5 = vpack.c.bf16 %v285_v4, %v283_v3  ;;  %v410_v6 = vld [vmem:[%s826_s2] ss:$0 sm:$0xff]  ;;  %v524_v13 = vpack.c.bf16 %v290_v12, %v288_v11  ;;  %v287_v14 = vld [vmem:[#allocation8 + $0xe0] sm:$0xff] }
  0x5d   :  { %484 = vmatprep.subr.bf16.mxu1 %v695_v1  ;;  %v289_v15 = vld [vmem:[#allocation8 + $0xf0] sm:$0xff] }
  0x5e   :  { %507 = vmatpush1.bf16.msra.mxu0 %v506_v47  ;;  %v526_v16 = vpack.c.bf16 %v289_v15, %v287_v14  ;;  %v412_v17 = vld [vmem:[%s828_s4] ss:$0 sm:$0xff]  ;;  %s696_s4 = smov [#allocation11]  }
  0x5f   :  { %509 = vmatprep.subr.bf16.mxu0 %v508_v48  ;;  %v291_v25 = vld [vmem:[%s830_s6] sm:$0x3]  ;;  %s395_s14 = sshll.u32 %s696_s4, 4  ;;  %s396_s14 = int_to_ptr.vmem [resolvable:$true] %s395_s14 }
  0x60   :  { %486 = vmatpush3.bf16.msra.mxu1 %v485_v18  ;;  %v300_v28 = vrot.slane %v291_v25, %v299_v26  ;;  %s631_s0 = scalar_lea.vmem %s396_s14, 128  ;;  %p636_p5 = scmp.lt.s32.totalorder %s396_s14, %s396_s14 }
  0x61   :  { %487 = vmatprep.subr.bf16.mxu1 %v695_v1  ;;  %p632_p4 = scmp.ne.s32.totalorder %s396_s14, %s631_s0  ;;  %p637_p6 = scmp.lt.s32.totalorder %s631_s0, %s631_s0 }
  0x62   :  { %511 = vmatpush1.bf16.msra.mxu0 %v510_v53 }
  0x63   :  { %513 = vmatprep.subr.bf16.mxu0 %v512_v54  ;;  %p638_p7 = por %p637_p6, %p636_p5 }
  0x64   :  { %489 = vmatpush3.bf16.msra.mxu1 %v488_v21 }
  0x65   :  { %490 = vmatprep.subr.bf16.mxu1 %v695_v1  ;;  %p639_p8 = pnand %p638_p7, %p632_p4 }
  0x66   :  { %515 = vmatpush1.bf16.msra.mxu0 %v514_v59 }
  0x67   :  { %517 = vmatprep.subr.bf16.mxu0 %v516_v60 }
  0x68   :  { %492 = vmatpush3.bf16.msra.mxu1 %v491_v24  ;;  %v295_v24 = vsub.s32 0, %v294_v23 }
  0x69   :  { %493 = vmatprep.subr.bf16.mxu1 %v695_v1  ;;  %v518_v1 = vpack.c.bf16 %v281_v62, %v279_v61 }
  0x6b   :  { %519 = vmatpush1.bf16.msra.mxu0 %v518_v1 }
  0x6c   :  { %495 = vmatpush3.bf16.msra.mxu1 %v494_v27  ;;  %521 = vmatprep.subr.bf16.mxu0 %v520_v2  ;;  %v296_v27 = vrot.slane %v291_v25, %v295_v24 }
  0x6f   :  { %523 = vmatpush1.bf16.msra.mxu0 %v522_v5 }
  0x70   :  { %525 = vmatprep.subr.bf16.mxu0 %v524_v13 }
  0x73   :  { %527 = vmatpush1.bf16.msra.mxu0 %v526_v16 }
 0x122   :  { %v160_v7 = vpop.f32.mrb[0].mxu0 }
 0x123   :  { %v161_v8 = vadd.f32 %v410_v6, %v160_v7  ;;  %v436_v9 = vpop.f32.mrb[1].mxu0 }
 0x125   :  { %v164_v10 = vmax.f32 %v161_v8, 0.0 }
 0x127   :  { %470 = vmatmul.mubr.f32.vlgmr.msra.gmra.mrb[0].mxu1 %v164_v10 }
 0x1fa   :  { %v254_v18 = vpop.f32.mrb[0].mxu1 }
 0x1fb   :  { %v255_v19 = vadd.f32 %v412_v17, %v254_v18  ;;  %v471_v20 = vpop.f32.mrb[1].mxu1 }
 0x1fd   :  { %v258_v21 = vmax.f32 %v255_v19, 0.0 }
 0x1ff   :  { %368 = vmatmul.mubr.f32.vlgmr.msra.gmra.mrb[2].mxu0 %v258_v21 }
 0x2d2   :  { %v369_v29 = vpop.f32.mrb[2].mxu0 }
 0x2d3   :  { %v370_v30 = vadd.f32 %v369_v29, %v296_v27  ;;  %v371_v31 = vpop.f32.mrb[3].mxu0 }
 0x2d4   :  { %v372_v32 = vadd.f32 %v371_v31, %v300_v28 }
 0x2d5   :  { %541 = vtanh.f32 %v370_v30 }
 0x2d6   :  { %v376_v33 = vmax.f32 %v372_v32, -20.0 }
 0x2d8   :  { %v377_v34 = vmin.f32 %v376_v33, 2.0 }
 0x2da   :  { %378 = vst [vmem:[#allocation11] sm:$0xff] %v377_v34 }
 0x2db   :  { %642 = shalt.err (!%p639_p8)
}
 0x2dc   :  { %s643_s17 = scalar_lea.hbm %s832_s8, 128 }
 0x2dd   :  { %p644_p9 = scmp.ne.s32.totalorder %s832_s8, %s643_s17  ;;  %p647_p10 = scmp.lt.u32.totalorder %s643_s17, %s832_s8 }
 0x2df   :  { %p649_p11 = pnand %p647_p10, %p644_p9 }
 0x2e1   :  { %652 = shalt.err (!%p649_p11)
}
 0x2e2   :  { %398 = dma.vmem_to_hbm [thread:$0]  %s396_s14, 128, %s832_s8, [#allocation12]   ;;  %v542_v35 = vpop.eup %541 }
 0x2e3   :  { %375 = vst [vmem:[#allocation10] sm:$0xff] %v542_v35  ;;  %s653_s24 = scalar_lea.vmem %s386_s16, 128  ;;  %p658_p13 = scmp.lt.s32.totalorder %s386_s16, %s386_s16 }
 0x2e4   :  { %p654_p12 = scmp.ne.s32.totalorder %s386_s16, %s653_s24  ;;  %p659_p0 = scmp.lt.s32.totalorder %s653_s24, %s653_s24 }
 0x2e6   :  { %p660_p1 = por %p659_p0, %p658_p13 }
 0x2e8   :  { %p661_p2 = pnand %p660_p1, %p654_p12 }
 0x2ea   :  { %664 = shalt.err (!%p661_p2)
}
 0x2eb   :  { %s665_s1 = scalar_lea.hbm %s831_s7, 128 }
 0x2ec   :  { %p666_p3 = scmp.ne.s32.totalorder %s831_s7, %s665_s1  ;;  %p669_p4 = scmp.lt.u32.totalorder %s665_s1, %s831_s7 }
 0x2ee   :  { %p671_p5 = pnand %p669_p4, %p666_p3 }
 0x2f0   :  { %674 = shalt.err (!%p671_p5)
}
 0x2f1   :  { %388 = dma.vmem_to_hbm [thread:$0]  %s386_s16, 128, %s831_s7, [#allocation4]  }
 0x2f2   :  { %681 = dma.done.wait [#allocation4], 128  }
 0x2f3   :  { %682 = vsyncadd [#allocation4], 4294967168 }
 0x2f4   :  { %683 = dma.done.wait [#allocation12], 128  }
 0x2f5   :  { %684 = vsyncadd [#allocation12], 4294967168 }
 0x2f6   :  { %405 = vsyncpa [#allocation3], 1 }
 0x2f7   :  { %406 = vsyncpa [#allocation6], 1 }
 0x2f8   :  { %407 = vsyncpa [#allocation9], 1 }
 0x2f9   :  { %408 = vsyncpa [#allocation4], 1 }
 0x2fa   :  { %409 = vsyncpa [#allocation12], 1 }

</bundles_post_ra>
